<compile_context>
chip_gen: v5e
topology: v5e:2x2
jax: 0.10.0
libtpu: 0.0.40
codegen_flags: <defaults>
</compile_context>

<pallas_src>
import functools

import jax
import jax.numpy as jnp
from jax.experimental import pallas as pl
from jax.experimental.pallas import tpu as pltpu

_LANES = 128


def _round_up(x, m):
    return (x + m - 1) // m * m


def _pick_tile(n, target, align):
    """Largest tile <= target that divides n and is a multiple of `align`
    (falls back to the full extent, which is always a legal block dim)."""
    if n <= target:
        return n
    t = (target // align) * align
    while t >= align:
        if n % t == 0:
            return t
        t -= align
    return n


# ----------------------------------------------------------------------------
# Kernel: per (i, k) grid step
#   i : tile of output-node rows                        -> "parallel"
#   k : tile of reduction nodes (cols of B / rows of h) -> "arbitrary"
# ----------------------------------------------------------------------------
def _gin_kernel(n_layers, bmat_ref, x_ref, *rest):
    # rest = (W0, b0, W1, b1, ..., out_ref, acc_ref)
    wb_refs = rest[:2 * n_layers]
    out_ref = rest[2 * n_layers]
    acc_ref = rest[2 * n_layers + 1]

    k = pl.program_id(1)

    @pl.when(k == 0)
    def _init():
        acc_ref[...] = jnp.zeros_like(acc_ref)

    # --- MLP for this k-tile of nodes: (Linear -> tanh) for every layer -----
    # (the torch module applies the activation after the output layer too).
    h = x_ref[...]
    for l in range(n_layers):
        w = wb_refs[2 * l][...]                    # [d_in, d_out]
        b = wb_refs[2 * l + 1][...]                # [1, d_out]
        h = jnp.tanh(jnp.dot(h, w, preferred_element_type=jnp.float32) + b)

    # --- Aggregation: new_state[i-tile] += B[i-tile, k-tile] @ h[k-tile] -----
    acc_ref[...] += jnp.dot(bmat_ref[...], h, preferred_element_type=jnp.float32)

    @pl.when(k == pl.num_programs(1) - 1)
    def _finalize():
        out_ref[...] = acc_ref[...].astype(out_ref.dtype)


# ----------------------------------------------------------------------------
# Wrapper
# ----------------------------------------------------------------------------
def gin_pre_transition(node_states, node_labels, edges, agg_matrix,
                       weights, biases, *, node_tile=512, red_tile=512):
    N = node_states.shape[0]
    d_in = node_states.shape[1] + node_labels.shape[1]
    d_o = weights[-1].shape[1]
    n_layers = len(weights)
    out_dtype = node_states.dtype

    # --- wrapper-side layout plumbing (no FLOP hoisting) ---------------------
    # single [states | labels] slab -> one K = ds+dl MXU dot for layer 0.
    x = jnp.concatenate([node_states.astype(jnp.float32),
                         node_labels.astype(jnp.float32)], axis=-1)

    # --- graph-structure precompute (kills the dense one-hot gather) ---------
    #   B[i, n] = sum_{e: edges[e,0]==n} agg[i,e] + sum_{e: edges[e,1]==n} agg[i,e]
    # so that  agg @ h[e1] + agg @ h[e0] == B @ h  (column scatter-add of agg).
    e = edges.astype(jnp.int32)
    agg_f32 = agg_matrix.astype(jnp.float32)
    bmat = jnp.zeros((N, N), dtype=jnp.float32)
    bmat = bmat.at[:, e[:, 0]].add(agg_f32)
    bmat = bmat.at[:, e[:, 1]].add(agg_f32)
    # TODO(synk): if edges/agg_matrix are static across message-passing steps
    # (the usual GNN case), hoist `bmat` out of the per-step call so this
    # scatter-add is paid exactly once.

    # --- lane-dense output: pad the last layer to a multiple of 128 lanes ----
    d_o_pad = max(_LANES, _round_up(d_o, _LANES))
    w_list = [w.astype(jnp.float32) for w in weights]
    b_list = [b.reshape(1, -1).astype(jnp.float32) for b in biases]
    if d_o_pad != d_o:
        w_list[-1] = jnp.pad(w_list[-1], ((0, 0), (0, d_o_pad - d_o)))
        b_list[-1] = jnp.pad(b_list[-1], ((0, 0), (0, d_o_pad - d_o)))
    # TODO(synk): optionally cast bmat / h to bf16 for native-rate MXU feeds
    # when tolerance allows; kept f32 here to match the torch reference.

    # --- tiling ---------------------------------------------------------------
    ti = _pick_tile(N, node_tile, 8)      # output-node rows   ("parallel")
    tk = _pick_tile(N, red_tile, _LANES)  # reduction nodes    ("arbitrary")
    num_i, num_k = N // ti, N // tk

    args = [bmat, x]
    in_specs = [
        pl.BlockSpec((ti, tk), lambda i, k: (i, k)),        # B tile
        pl.BlockSpec((tk, d_in), lambda i, k: (k, 0)),       # node-feature tile
    ]
    for w, b in zip(w_list, b_list):
        args += [w, b]
        in_specs += [pl.BlockSpec(w.shape, lambda i, k: (0, 0)),
                     pl.BlockSpec(b.shape, lambda i, k: (0, 0))]

    # --- VMEM budget (explicit, with headroom) --------------------------------
    param_bytes = 4 * sum(int(w.size) + int(b.size) for w, b in zip(w_list, b_list))
    block_bytes = 4 * (2 * ti * tk          # B tile, double buffered
                       + 2 * tk * d_in      # feature tile, double buffered
                       + 2 * ti * d_o_pad   # output block
                       + ti * d_o_pad)      # f32 accumulator scratch
    vmem_limit = int(min(64 * 1024 * 1024,
                         max(4 * (block_bytes + 2 * param_bytes),
                             16 * 1024 * 1024)))

    # --- advisory cost estimate ------------------------------------------------
    mlp_flops = 2 * num_i * N * sum(int(w.shape[0]) * int(w.shape[1]) for w in w_list)
    agg_flops = 2 * N * N * d_o_pad
    tanh_count = num_i * N * sum(int(w.shape[1]) for w in w_list)
    bytes_accessed = int(4 * (N * N + num_i * N * d_in + N * d_o_pad)
                         + num_i * num_k * param_bytes)

    out = pl.pallas_call(
        functools.partial(_gin_kernel, n_layers),
        out_shape=jax.ShapeDtypeStruct((N, d_o_pad), out_dtype),
        grid=(num_i, num_k),
        in_specs=in_specs,
        out_specs=pl.BlockSpec((ti, d_o_pad), lambda i, k: (i, 0)),
        scratch_shapes=[pltpu.VMEM((ti, d_o_pad), jnp.float32)],
        compiler_params=pltpu.CompilerParams(
            dimension_semantics=("parallel", "arbitrary"),
            vmem_limit_bytes=vmem_limit),
        cost_estimate=pl.CostEstimate(flops=int(mlp_flops + agg_flops),
                                      transcendentals=int(tanh_count),
                                      bytes_accessed=bytes_accessed),
    )(*args)
    # TODO(synk): if this op is invoked for many graphs / iterations, add a
    # leading batch grid axis so weights stay VMEM-resident and per-call
    # dispatch overhead is amortized.
    return out[:, :d_o]


# ----------------------------------------------------------------------------
# Deterministic parameter init (xavier-normal weights, torch-style biases),
# matching MLP(d_i, [hidden...], d_o) with activation_out = tanh.
# ----------------------------------------------------------------------------
def init_mlp_params(key, d_i, hidden_sizes, d_o):
    sizes = [d_i] + list(hidden_sizes) + [d_o]
    weights, biases = [], []
    for idx in range(len(sizes) - 1):
        fan_in, fan_out = sizes[idx], sizes[idx + 1]
        key, kw, kb = jax.random.split(key, 3)
        std = (2.0 / (fan_in + fan_out)) ** 0.5          # xavier_normal_
        w = std * jax.random.normal(kw, (fan_in, fan_out), dtype=jnp.float32)
        bound = 1.0 / (fan_in ** 0.5)                    # torch Linear bias init
        b = jax.random.uniform(kb, (fan_out,), dtype=jnp.float32,
                               minval=-bound, maxval=bound)
        weights.append(w)
        biases.append(b)
    return weights, biases


if __name__ == "__main__":
    # small shapes consistent with the module
    N = 32                 # number of nodes
    E = 64                 # number of edges
    node_state_dim = 16
    node_label_dim = 16
    mlp_hidden_dim = [32]

    key = jax.random.PRNGKey(0)
    k_s, k_l, k_e, k_a, k_p = jax.random.split(key, 5)

    node_states = jax.random.normal(k_s, (N, node_state_dim), dtype=jnp.float32)
    node_labels = jax.random.normal(k_l, (N, node_label_dim), dtype=jnp.float32)
    edges = jax.random.randint(k_e, (E, 2), 0, N, dtype=jnp.int32)
    agg_matrix = jax.random.normal(k_a, (N, E), dtype=jnp.float32)

    weights, biases = init_mlp_params(
        k_p, node_state_dim + node_label_dim, mlp_hidden_dim, node_state_dim)

    fn = jax.jit(gin_pre_transition)
    new_state = jax.block_until_ready(
        fn(node_states, node_labels, edges, agg_matrix, weights, biases))

    # reference check in plain JAX (same math as the PyTorch module)
    x = jnp.concatenate([node_states, node_labels], axis=-1)
    h = x
    for w, b in zip(weights, biases):
        h = jnp.tanh(h @ w + b)
    ref = agg_matrix @ h[edges[:, 1]] + agg_matrix @ h[edges[:, 0]]

    assert new_state.shape == (N, node_state_dim), new_state.shape
    max_err = float(jnp.max(jnp.abs(new_state - ref)))
    assert jnp.allclose(new_state, ref, atol=5e-4, rtol=5e-4), max_err

    print("KERNEL_OK")
</pallas_src>

<mosaic_0001>
module attributes {stable_mosaic.version = 11 : i64} {
  func.func @_gin_kernel(%arg0: i32, %arg1: i32, %arg2: memref<32x32xf32, #tpu.memory_space<vmem>>, %arg3: memref<32x32xf32, #tpu.memory_space<vmem>>, %arg4: memref<32x32xf32, #tpu.memory_space<vmem>>, %arg5: memref<1x32xf32, #tpu.memory_space<vmem>>, %arg6: memref<32x128xf32, #tpu.memory_space<vmem>>, %arg7: memref<1x128xf32, #tpu.memory_space<vmem>>, %arg8: memref<32x128xf32, #tpu.memory_space<vmem>>, %arg9: memref<32x128xf32, #tpu.memory_space<vmem>>) attributes {dimension_semantics = [#tpu.dimension_semantics<parallel>, #tpu.dimension_semantics<arbitrary>], iteration_bounds = array<i64: 1, 1>, scalar_prefetch = 0 : i64, scratch_operands = 1 : i64, tpu.core_type = #tpu.core_type<tc>, window_params = [{transform_indices = @transform_0, window_bounds = array<i64: 32, 32>}, {transform_indices = @transform_1, window_bounds = array<i64: 32, 32>}, {pipeline_mode = #tpu.pipeline_mode<synchronous>, transform_indices = @transform_2, window_bounds = array<i64: 32, 32>}, {pipeline_mode = #tpu.pipeline_mode<synchronous>, transform_indices = @transform_3, window_bounds = array<i64: 1, 32>}, {pipeline_mode = #tpu.pipeline_mode<synchronous>, transform_indices = @transform_4, window_bounds = array<i64: 32, 128>}, {pipeline_mode = #tpu.pipeline_mode<synchronous>, transform_indices = @transform_5, window_bounds = array<i64: 1, 128>}, {transform_indices = @transform_6, window_bounds = array<i64: 32, 128>}]} {
    %c0_i32 = arith.constant 0 : i32
    %0 = arith.cmpi eq, %arg1, %c0_i32 : i32
    %1 = arith.extui %0 : i1 to i32
    %c0_i32_0 = arith.constant 0 : i32
    %2 = arith.cmpi ne, %1, %c0_i32_0 : i32
    scf.if %2 {
      %cst_20 = arith.constant 0.000000e+00 : f32
      %24 = vector.broadcast %cst_20 : f32 to vector<32x128xf32>
      %c0_21 = arith.constant 0 : index
      %c0_22 = arith.constant 0 : index
      %25 = vector.load %arg9[%c0_21, %c0_22] : memref<32x128xf32, #tpu.memory_space<vmem>>, vector<32x128xf32>
      tpu.vector_store %arg9[%c0_21, %c0_22], %24 {strides = array<i32>} : memref<32x128xf32, #tpu.memory_space<vmem>>, vector<32x128xf32>,
    } else {
    }
    %c0 = arith.constant 0 : index
    %c0_1 = arith.constant 0 : index
    %3 = vector.load %arg3[%c0, %c0_1] : memref<32x32xf32, #tpu.memory_space<vmem>>, vector<32x32xf32>
    %c0_2 = arith.constant 0 : index
    %c0_3 = arith.constant 0 : index
    %4 = vector.load %arg4[%c0_2, %c0_3] : memref<32x32xf32, #tpu.memory_space<vmem>>, vector<32x32xf32>
    %c0_4 = arith.constant 0 : index
    %c0_5 = arith.constant 0 : index
    %5 = vector.load %arg5[%c0_4, %c0_5] : memref<1x32xf32, #tpu.memory_space<vmem>>, vector<1x32xf32>
    %cst = arith.constant dense<0.000000e+00> : vector<32x32xf32>
    %6 = tpu.matmul %3, %4, %cst {dimension_numbers = #tpu.dot_dimension_numbers<[1], [0], [0], [1], [0, 0, 1, 1], [], []>} : vector<32x32xf32>, vector<32x32xf32>, vector<32x32xf32> -> vector<32x32xf32>
    %7 = vector.broadcast %5 : vector<1x32xf32> to vector<32x32xf32>
    %8 = arith.addf %6, %7 : vector<32x32xf32>
    %9 = math.tanh %8 : vector<32x32xf32>
    %c0_6 = arith.constant 0 : index
    %c0_7 = arith.constant 0 : index
    %10 = vector.load %arg6[%c0_6, %c0_7] : memref<32x128xf32, #tpu.memory_space<vmem>>, vector<32x128xf32>
    %c0_8 = arith.constant 0 : index
    %c0_9 = arith.constant 0 : index
    %11 = vector.load %arg7[%c0_8, %c0_9] : memref<1x128xf32, #tpu.memory_space<vmem>>, vector<1x128xf32>
    %cst_10 = arith.constant dense<0.000000e+00> : vector<32x128xf32>
    %12 = tpu.matmul %9, %10, %cst_10 {dimension_numbers = #tpu.dot_dimension_numbers<[1], [0], [0], [1], [0, 0, 1, 1], [], []>} : vector<32x32xf32>, vector<32x128xf32>, vector<32x128xf32> -> vector<32x128xf32>
    %13 = vector.broadcast %11 : vector<1x128xf32> to vector<32x128xf32>
    %14 = arith.addf %12, %13 : vector<32x128xf32>
    %15 = math.tanh %14 : vector<32x128xf32>
    %c0_11 = arith.constant 0 : index
    %c0_12 = arith.constant 0 : index
    %16 = vector.load %arg9[%c0_11, %c0_12] : memref<32x128xf32, #tpu.memory_space<vmem>>, vector<32x128xf32>
    %c0_13 = arith.constant 0 : index
    %c0_14 = arith.constant 0 : index
    %17 = vector.load %arg2[%c0_13, %c0_14] : memref<32x32xf32, #tpu.memory_space<vmem>>, vector<32x32xf32>
    %cst_15 = arith.constant dense<0.000000e+00> : vector<32x128xf32>
    %18 = tpu.matmul %17, %15, %cst_15 {dimension_numbers = #tpu.dot_dimension_numbers<[1], [0], [0], [1], [0, 0, 1, 1], [], []>} : vector<32x32xf32>, vector<32x128xf32>, vector<32x128xf32> -> vector<32x128xf32>
    %19 = arith.addf %16, %18 : vector<32x128xf32>
    %c0_16 = arith.constant 0 : index
    %c0_17 = arith.constant 0 : index
    %20 = vector.load %arg9[%c0_16, %c0_17] : memref<32x128xf32, #tpu.memory_space<vmem>>, vector<32x128xf32>
    tpu.vector_store %arg9[%c0_16, %c0_17], %19 {strides = array<i32>} : memref<32x128xf32, #tpu.memory_space<vmem>>, vector<32x128xf32>,
    %c0_i32_18 = arith.constant 0 : i32
    %21 = arith.cmpi eq, %arg1, %c0_i32_18 : i32
    %22 = arith.extui %21 : i1 to i32
    %c0_i32_19 = arith.constant 0 : i32
    %23 = arith.cmpi ne, %22, %c0_i32_19 : i32
    scf.if %23 {
      %c0_20 = arith.constant 0 : index
      %c0_21 = arith.constant 0 : index
      %24 = vector.load %arg9[%c0_20, %c0_21] : memref<32x128xf32, #tpu.memory_space<vmem>>, vector<32x128xf32>
      %c0_22 = arith.constant 0 : index
      %c0_23 = arith.constant 0 : index
      %25 = vector.load %arg8[%c0_22, %c0_23] : memref<32x128xf32, #tpu.memory_space<vmem>>, vector<32x128xf32>
      tpu.vector_store %arg8[%c0_22, %c0_23], %24 {strides = array<i32>} : memref<32x128xf32, #tpu.memory_space<vmem>>, vector<32x128xf32>,
    } else {
    }
    return
  }
  func.func @transform_0(%arg0: i32, %arg1: i32) -> (i32, i32) {
    %c0_i32 = arith.constant 0 : i32
    return %arg0, %arg1 : i32, i32
  }
  func.func @transform_1(%arg0: i32, %arg1: i32) -> (i32, i32) {
    %c0_i32 = arith.constant 0 : i32
    %c0_i32_0 = arith.constant 0 : i32
    return %arg1, %c0_i32 : i32, i32
  }
  func.func @transform_2(%arg0: i32, %arg1: i32) -> (i32, i32) {
    %c0_i32 = arith.constant 0 : i32
    %c0_i32_0 = arith.constant 0 : i32
    %c0_i32_1 = arith.constant 0 : i32
    return %c0_i32, %c0_i32_0 : i32, i32
  }
  func.func @transform_3(%arg0: i32, %arg1: i32) -> (i32, i32) {
    %c0_i32 = arith.constant 0 : i32
    %c0_i32_0 = arith.constant 0 : i32
    %c0_i32_1 = arith.constant 0 : i32
    return %c0_i32, %c0_i32_0 : i32, i32
  }
  func.func @transform_4(%arg0: i32, %arg1: i32) -> (i32, i32) {
    %c0_i32 = arith.constant 0 : i32
    %c0_i32_0 = arith.constant 0 : i32
    %c0_i32_1 = arith.constant 0 : i32
    return %c0_i32, %c0_i32_0 : i32, i32
  }
  func.func @transform_5(%arg0: i32, %arg1: i32) -> (i32, i32) {
    %c0_i32 = arith.constant 0 : i32
    %c0_i32_0 = arith.constant 0 : i32
    %c0_i32_1 = arith.constant 0 : i32
    return %c0_i32, %c0_i32_0 : i32, i32
  }
  func.func @transform_6(%arg0: i32, %arg1: i32) -> (i32, i32) {
    %c0_i32 = arith.constant 0 : i32
    %c0_i32_0 = arith.constant 0 : i32
    return %arg0, %c0_i32 : i32, i32
  }
}

</mosaic_0001>

<bundles_post_ra>
// kernel: gin_pre_transition.1
= control target key start
LH: loop header
LB: loop body
LE: loop exit
PB: predicated region body
PF: predicated region fallthrough
CT: control target
= control target key end

     0   :  { %vm43_vm0 = vcmask 261120   ;;  %s369_s2 = inlined_call_operand.vmem [shape: f32[32,32], index: 2, kind: input, shape index: {}]   ;;  %s370_s3 = inlined_call_operand.vmem [shape: f32[1,32], index: 3, kind: input, shape index: {}]   ;;  %s371_s1 = inlined_call_operand.vmem [shape: f32[32,32], index: 1, kind: input, shape index: {}]   ;;  %s372_s5 = inlined_call_operand.vmem [shape: f32[1,128], index: 5, kind: input, shape index: {}]   ;;  %s373_s4 = inlined_call_operand.vmem [shape: f32[32,128], index: 4, kind: input, shape index: {}]   ;;  %s374_s0 = inlined_call_operand.vmem [shape: f32[32,32], index: 0, kind: input, shape index: {}]   ;;  %s375_s6 = inlined_call_operand.vmem [shape: f32[32,128], index: 6, kind: output, shape index: {}]  }
   0x1   :  { %v38_v0 = vld [vmem:[%s369_s2 + $0x18] sm:$0xff]  ;;  %v37_v1 = vld [vmem:[%s369_s2 + $0x10] sm:$0xff]  ;;  %v36_v2 = vld [vmem:[%s369_s2 + $0x8] sm:$0xff] }
   0x2   :  { %226 = vmatpush.msra.mxu3 %v38_v0  ;;  %68 = vmatpush.msra.mxu0 %v38_v0  ;;  %v35_v3 = vld [vmem:[%s369_s2] sm:$0xff]  ;;  %v32_v4 = vld [vmem:[%s371_s1 + $0x8] sm:$0xff]  ;;  %v33_v6 = vld [vmem:[%s371_s1 + $0x10] sm:$0xff] }
   0x3   :  { %v31_v5 = vld [vmem:[%s371_s1] sm:$0xff]  ;;  %v34_v7 = vld [vmem:[%s371_s1 + $0x18] sm:$0xff]  ;;  %v91_v9 = vld [vmem:[%s373_s4 + $0x10] sm:$0xff] }
   0x4   :  { %227 = vmatpush.msra.mxu3 %v37_v1  ;;  %69 = vmatpush.msra.mxu0 %v37_v1  ;;  %v92_v8 = vld [vmem:[%s373_s4 + $0x18] sm:$0xff]  ;;  %v90_v10 = vld [vmem:[%s373_s4 + $0x8] sm:$0xff]  ;;  %v89_v11 = vld [vmem:[%s373_s4] sm:$0xff] }
   0x5   :  { %230 = vmatpush.msra.mxu1 %v92_v8  ;;  %v238_v12 = vld [vmem:[%s370_s3] ss:$0 sm:$0xff]  ;;  %v147_v38 = vld [vmem:[%s374_s0 + $0x8] sm:$0xff]  ;;  %v148_v40 = vld [vmem:[%s374_s0 + $0x10] sm:$0xff] }
   0x6   :  { %228 = vmatpush.msra.mxu3 %v36_v2  ;;  %70 = vmatpush.msra.mxu0 %v36_v2  ;;  %v239_v27 = vld [vmem:[%s372_s5] ss:$0 sm:$0xff]  ;;  %v149_v41 = vld [vmem:[%s374_s0 + $0x18] sm:$0xff] }
   0x7   :  { %231 = vmatpush.msra.mxu1 %v91_v9  ;;  %v146_v39 = vld [vmem:[%s374_s0] sm:$0xff] }
   0x8   :  { %229 = vmatpush.msra.mxu3 %v35_v3  ;;  %71 = vmatpush.msra.mxu0 %v35_v3 }
   0x9   :  { %215 = vmatmul.msk.f32.vlgmr.msra.gmra.mxu3 %vm43_vm0, %v32_v4  ;;  %214 = vmatmul.msk.f32.vlgmr.msra.gmra.mxu0 %vm43_vm0, %v31_v5 }
   0xa   :  { %121 = vmatpush.msrb.mxu0 %v92_v8  ;;  %232 = vmatpush.msra.mxu1 %v90_v10 }
   0xc   :  { %122 = vmatpush.msrb.mxu0 %v91_v9  ;;  %233 = vmatpush.msra.mxu1 %v89_v11 }
   0xe   :  { %123 = vmatpush.msrb.mxu0 %v90_v10 }
  0x10   :  { %124 = vmatpush.msrb.mxu0 %v89_v11 }
  0x11   :  { %216 = vmatmul.msk.f32.gmra.mxu3 %vm43_vm0, %v33_v6 }
  0x19   :  { %217 = vmatmul.msk.f32.gmra.mxu3 %vm43_vm0, %v34_v7 }
  0x86   :  { %v73_v13 = vpop.f32.mrf.mxu0 }
  0x87   :  { %v74_v14 = vadd.f32 %v238_v12, %v73_v13 }
  0x89   :  { %240 = vtanh.f32 %v74_v14 }
  0x8c   :  { %v76_v15 = vpop.f32.mrf.mxu3 }
  0x8d   :  { %v77_v16 = vadd.f32 %v238_v12, %v76_v15 }
  0x8f   :  { %v241_v17 = vpop.eup %240  ;;  %242 = vtanh.f32 %v77_v16 }
  0x90   :  { %218 = vmatmul.msk.f32.vlgmr.msrb.gmra.mxu0 %vm43_vm0, %v241_v17 }
  0x94   :  { %v79_v18 = vpop.f32.mrf.mxu3 }
  0x95   :  { %v243_v19 = vpop.eup %242  ;;  %v80_v20 = vadd.f32 %v238_v12, %v79_v18 }
  0x96   :  { %219 = vmatmul.msk.f32.vlgmr.msra.gmra.mxu1 %vm43_vm0, %v243_v19 }
  0x97   :  { %244 = vtanh.f32 %v80_v20 }
  0x9c   :  { %v82_v21 = vpop.f32.mrf.mxu3 }
  0x9d   :  { %v245_v22 = vpop.eup %244  ;;  %v83_v23 = vadd.f32 %v238_v12, %v82_v21 }
  0x9e   :  { %220 = vmatmul.msk.f32.gmra.mxu1 %vm43_vm0, %v245_v22 }
  0x9f   :  { %246 = vtanh.f32 %v83_v23 }
  0xa5   :  { %v247_v24 = vpop.eup %246 }
  0xa6   :  { %221 = vmatmul.msk.f32.gmra.mxu1 %vm43_vm0, %v247_v24 }
 0x10d   :  { %v126_v28 = vpop.f32.mrf.mxu0 }
 0x10e   :  { %v127_v32 = vadd.f32 %v239_v27, %v126_v28 }
 0x113   :  { %v129_v25 = vpop.f32.mrf.mxu1 }
 0x114   :  { %v130_v33 = vadd.f32 %v239_v27, %v129_v25 }
 0x11b   :  { %v132_v26 = vpop.f32.mrf.mxu1 }
 0x11c   :  { %v133_v30 = vadd.f32 %v239_v27, %v132_v26 }
 0x123   :  { %v135_v29 = vpop.f32.mrf.mxu1 }
 0x124   :  { %v136_v31 = vadd.f32 %v239_v27, %v135_v29 }
 0x126   :  { %248 = vtanh.f32 %v136_v31 }
 0x127   :  { %250 = vtanh.f32 %v133_v30 }
 0x128   :  { %252 = vtanh.f32 %v127_v32 }
 0x129   :  { %254 = vtanh.f32 %v130_v33 }
 0x12c   :  { %v249_v34 = vpop.eup %248 }
 0x12d   :  { %174 = vmatpush.msra.mxu0 %v249_v34  ;;  %234 = vmatpush.msra.mxu2 %v249_v34  ;;  %v251_v35 = vpop.eup %250 }
 0x12e   :  { %v253_v36 = vpop.eup %252 }
 0x12f   :  { %175 = vmatpush.msra.mxu0 %v251_v35  ;;  %235 = vmatpush.msra.mxu2 %v251_v35  ;;  %v255_v37 = vpop.eup %254 }
 0x131   :  { %176 = vmatpush.msra.mxu0 %v255_v37  ;;  %236 = vmatpush.msra.mxu2 %v255_v37 }
 0x133   :  { %177 = vmatpush.msra.mxu0 %v253_v36  ;;  %237 = vmatpush.msra.mxu2 %v253_v36 }
 0x134   :  { %223 = vmatmul.msk.f32.vlgmr.msra.gmra.mxu2 %vm43_vm0, %v147_v38  ;;  %222 = vmatmul.msk.f32.vlgmr.msra.gmra.mxu0 %vm43_vm0, %v146_v39 }
 0x13c   :  { %224 = vmatmul.msk.f32.gmra.mxu2 %vm43_vm0, %v148_v40 }
 0x144   :  { %225 = vmatmul.msk.f32.gmra.mxu2 %vm43_vm0, %v149_v41 }
 0x1b1   :  { %v179_v42 = vpop.f32.mrf.mxu0 }
 0x1b2   :  { %206 = vst [vmem:[%s375_s6] sm:$0xff] %v179_v42 }
 0x1b7   :  { %v182_v43 = vpop.f32.mrf.mxu2 }
 0x1b8   :  { %207 = vst [vmem:[%s375_s6 + $0x8] sm:$0xff] %v182_v43 }
 0x1bf   :  { %v185_v44 = vpop.f32.mrf.mxu2 }
 0x1c0   :  { %208 = vst [vmem:[%s375_s6 + $0x10] sm:$0xff] %v185_v44 }
 0x1c7   :  { %v188_v45 = vpop.f32.mrf.mxu2 }
 0x1c8   :  { %209 = vst [vmem:[%s375_s6 + $0x18] sm:$0xff] %v188_v45 }

</bundles_post_ra>
